<compile_context>
chip_gen: v7x
topology: tpu7x:2x2x1
jax: 0.10.0
libtpu: 0.0.40
codegen_flags: <defaults>
</compile_context>

<pallas_src>
import functools
import math

import jax
import jax.numpy as jnp
from jax.experimental import pallas as pl
from jax.experimental.pallas import tpu as pltpu

_LANES = 128
_SUBLANES = 8


def _round_up(a, b):
    return ((a + b - 1) // b) * b


def _balanced_partial_kernel(
    x_ref, t_ref, out_ref, pos_acc, neg_acc, bpos_acc, bneg_acc, *, tile_rows
):
    """Accumulates vreg-shaped partial sums over the inner ('arbitrary') grid axis."""
    i = pl.program_id(1)

    @pl.when(i == 0)
    def _():
        pos_acc[...] = jnp.zeros_like(pos_acc)
        neg_acc[...] = jnp.zeros_like(neg_acc)
        bpos_acc[...] = jnp.zeros_like(bpos_acc)
        bneg_acc[...] = jnp.zeros_like(bneg_acc)

    x = x_ref[...].astype(jnp.float32)
    t = t_ref[...].astype(jnp.float32)

    pos = (t == 1.0).astype(jnp.float32)
    neg = (t == 0.0).astype(jnp.float32)

    # Numerically stable BCE-with-logits (PyTorch formulation):
    #   l(x, t) = max(x, 0) - x*t + log(1 + exp(-|x|))
    bce = jnp.maximum(x, 0.0) - x * t + jnp.log1p(jnp.exp(-jnp.abs(x)))

    # Fold (tile_rows, 128) -> (8, 128) with VALU adds only (no cross-lane XLU
    # work in the per-tile path).
    def fold(v):
        return v.reshape(tile_rows // _SUBLANES, _SUBLANES, _LANES).sum(axis=0)

    pos_acc[...] += fold(pos)
    neg_acc[...] += fold(neg)
    bpos_acc[...] += fold(bce * pos)
    bneg_acc[...] += fold(bce * neg)

    # Finalize: emit this split's vreg-shaped partials once.
    @pl.when(i == pl.num_programs(1) - 1)
    def _():
        out_ref[0, 0, :, :] = pos_acc[...]
        out_ref[0, 1, :, :] = neg_acc[...]
        out_ref[0, 2, :, :] = bpos_acc[...]
        out_ref[0, 3, :, :] = bneg_acc[...]


def balanced_loss(logits, target, neg_weight=1.0, *, tile_rows=512, max_splits=2):
    """Pallas TPU implementation of BalancedLoss.forward. Returns a scalar f32."""
    assert logits.shape == target.shape
    neg_weight = float(neg_weight)

    # Keep native dtypes (no up-cast); bool/unsigned targets get a signed int
    # container so the -1 padding sentinel is representable.
    if target.dtype == jnp.bool_ or jnp.issubdtype(target.dtype, jnp.unsignedinteger):
        target = target.astype(jnp.int8)

    n = math.prod(logits.shape)
    rows_needed = -(-n // _LANES)

    # Tile sizing: multiple of 8 sublanes, no larger than needed for tiny inputs.
    tile_rows = max(_SUBLANES, min(int(tile_rows), _round_up(rows_needed, _SUBLANES)))
    tile_rows = _round_up(tile_rows, _SUBLANES)
    block_elems = tile_rows * _LANES

    total_blocks = -(-n // block_elems)
    n_splits = max(1, min(int(max_splits), total_blocks))
    total_blocks = _round_up(total_blocks, n_splits)
    tiles_per_split = total_blocks // n_splits

    padded = total_blocks * block_elems
    pad = padded - n

    x_flat = logits.reshape(-1)
    t_flat = target.reshape(-1)
    if pad:
        # Padding target with -1 puts padded elements in neither pos nor neg mask.
        x_flat = jnp.pad(x_flat, (0, pad))
        t_flat = jnp.pad(t_flat, (0, pad), constant_values=-1)

    x2 = x_flat.reshape(total_blocks * tile_rows, _LANES)
    t2 = t_flat.reshape(total_blocks * tile_rows, _LANES)

    kernel = functools.partial(_balanced_partial_kernel, tile_rows=tile_rows)

    in_map = lambda s, i: (s * tiles_per_split + i, 0)
    partials = pl.pallas_call(
        kernel,
        out_shape=jax.ShapeDtypeStruct((n_splits, 4, _SUBLANES, _LANES), jnp.float32),
        grid=(n_splits, tiles_per_split),
        in_specs=[
            pl.BlockSpec((tile_rows, _LANES), in_map),
            pl.BlockSpec((tile_rows, _LANES), in_map),
        ],
        out_specs=pl.BlockSpec(
            (1, 4, _SUBLANES, _LANES), lambda s, i: (s, 0, 0, 0)
        ),
        scratch_shapes=[pltpu.VMEM((_SUBLANES, _LANES), jnp.float32)] * 4,
        compiler_params=pltpu.CompilerParams(
            dimension_semantics=("parallel", "arbitrary")
        ),
    )(x2, t2)

    # Tiny final combine (cross-lane reduce happens once, here).
    sums = jnp.sum(partials, axis=(0, 2, 3))  # [pos_num, neg_num, sum_pos, sum_neg]
    pos_num, neg_num, sum_pos, sum_neg = sums[0], sums[1], sums[2], sums[3]

    pos_term = jnp.where(pos_num > 0, sum_pos / jnp.maximum(pos_num, 1.0), 0.0)
    neg_term = jnp.where(neg_num > 0, sum_neg / jnp.maximum(neg_num, 1.0), 0.0)
    w_sum = jnp.where(pos_num > 0, 1.0, 0.0) + neg_weight * jnp.where(
        neg_num > 0, 1.0, 0.0
    )
    # If the target has no 0s and no 1s, this is 0/0 = NaN, matching PyTorch.
    return (pos_term + neg_weight * neg_term) / w_sum


def _reference_balanced_loss(logits, target, neg_weight=1.0):
    """Pure-JAX reference (mirrors the PyTorch module) for validation."""
    x = logits.astype(jnp.float32)
    t = target.astype(jnp.float32)
    pos_mask = t == 1.0
    neg_mask = t == 0.0
    pos_num = jnp.sum(pos_mask).astype(jnp.float32)
    neg_num = jnp.sum(neg_mask).astype(jnp.float32)
    w = jnp.where(pos_mask, 1.0 / pos_num, 0.0)
    w = jnp.where(neg_mask, (1.0 / neg_num) * neg_weight, w)
    w = w / jnp.sum(w)
    bce = jnp.maximum(x, 0.0) - x * t + jnp.log1p(jnp.exp(-jnp.abs(x)))
    return jnp.sum(w * bce)


if __name__ == "__main__":
    key = jax.random.PRNGKey(0)

    def make(shape, k, dtype=jnp.float32):
        k1, k2 = jax.random.split(k)
        logits = jax.random.normal(k1, shape, dtype=jnp.float32).astype(dtype)
        target = jax.random.bernoulli(k2, p=0.25, shape=shape).astype(jnp.float32)
        return logits, target

    cases = [
        # (shape, neg_weight, logits dtype, kwargs)
        ((2, 1, 15, 15), 1.0, jnp.float32, {}),                 # real SiamFC-style map, needs padding
        ((2, 1, 16, 16), 0.5, jnp.float32, {}),                 # lane-exact size, neg_weight != 1
        ((8, 1, 33, 33), 1.0, jnp.float32, dict(tile_rows=16, max_splits=2)),  # multi-tile, 2-way split
        ((2, 1, 17, 17), 1.0, jnp.bfloat16, {}),                # native bf16 logits path
    ]

    for shape, nw, dtype, kw in cases:
        key, sub = jax.random.split(key)
        logits, target = make(shape, sub, dtype)
        loss = jax.block_until_ready(balanced_loss(logits, target, neg_weight=nw, **kw))
        ref = jax.block_until_ready(_reference_balanced_loss(logits, target, nw))
        assert jnp.allclose(loss, ref, rtol=1e-4, atol=1e-5), (shape, loss, ref)

    print("KERNEL_OK")
</pallas_src>

<mosaic_0001>
module attributes {stable_mosaic.version = 11 : i64} {
  func.func @_balanced_partial_kernel(%arg0: i32, %arg1: i32, %arg2: memref<8x128xf32, #tpu.memory_space<vmem>>, %arg3: memref<8x128xf32, #tpu.memory_space<vmem>>, %arg4: memref<1x4x8x128xf32, #tpu.memory_space<vmem>>, %arg5: memref<8x128xf32, #tpu.memory_space<vmem>>, %arg6: memref<8x128xf32, #tpu.memory_space<vmem>>, %arg7: memref<8x128xf32, #tpu.memory_space<vmem>>, %arg8: memref<8x128xf32, #tpu.memory_space<vmem>>) attributes {dimension_semantics = [#tpu.dimension_semantics<parallel>, #tpu.dimension_semantics<arbitrary>], iteration_bounds = array<i64: 1, 1>, scalar_prefetch = 0 : i64, scratch_operands = 4 : i64, tpu.core_type = #tpu.core_type<tc>, window_params = [{transform_indices = @transform_0, window_bounds = array<i64: 8, 128>}, {transform_indices = @transform_1, window_bounds = array<i64: 8, 128>}, {transform_indices = @transform_2, window_bounds = array<i64: 1, 4, 8, 128>}]} {
    %c0_i32 = arith.constant 0 : i32
    %0 = arith.cmpi eq, %arg1, %c0_i32 : i32
    %1 = arith.extui %0 : i1 to i32
    %c0_i32_0 = arith.constant 0 : i32
    %2 = arith.cmpi ne, %1, %c0_i32_0 : i32
    scf.if %2 {
      %cst_29 = arith.constant 0.000000e+00 : f32
      %48 = vector.broadcast %cst_29 : f32 to vector<8x128xf32>
      %c0_30 = arith.constant 0 : index
      %c0_31 = arith.constant 0 : index
      %49 = vector.load %arg5[%c0_30, %c0_31] : memref<8x128xf32, #tpu.memory_space<vmem>>, vector<8x128xf32>
      tpu.vector_store %arg5[%c0_30, %c0_31], %48 {strides = array<i32>} : memref<8x128xf32, #tpu.memory_space<vmem>>, vector<8x128xf32>,
      %cst_32 = arith.constant 0.000000e+00 : f32
      %50 = vector.broadcast %cst_32 : f32 to vector<8x128xf32>
      %c0_33 = arith.constant 0 : index
      %c0_34 = arith.constant 0 : index
      %51 = vector.load %arg6[%c0_33, %c0_34] : memref<8x128xf32, #tpu.memory_space<vmem>>, vector<8x128xf32>
      tpu.vector_store %arg6[%c0_33, %c0_34], %50 {strides = array<i32>} : memref<8x128xf32, #tpu.memory_space<vmem>>, vector<8x128xf32>,
      %cst_35 = arith.constant 0.000000e+00 : f32
      %52 = vector.broadcast %cst_35 : f32 to vector<8x128xf32>
      %c0_36 = arith.constant 0 : index
      %c0_37 = arith.constant 0 : index
      %53 = vector.load %arg7[%c0_36, %c0_37] : memref<8x128xf32, #tpu.memory_space<vmem>>, vector<8x128xf32>
      tpu.vector_store %arg7[%c0_36, %c0_37], %52 {strides = array<i32>} : memref<8x128xf32, #tpu.memory_space<vmem>>, vector<8x128xf32>,
      %cst_38 = arith.constant 0.000000e+00 : f32
      %54 = vector.broadcast %cst_38 : f32 to vector<8x128xf32>
      %c0_39 = arith.constant 0 : index
      %c0_40 = arith.constant 0 : index
      %55 = vector.load %arg8[%c0_39, %c0_40] : memref<8x128xf32, #tpu.memory_space<vmem>>, vector<8x128xf32>
      tpu.vector_store %arg8[%c0_39, %c0_40], %54 {strides = array<i32>} : memref<8x128xf32, #tpu.memory_space<vmem>>, vector<8x128xf32>,
    } else {
    }
    %c0 = arith.constant 0 : index
    %c0_1 = arith.constant 0 : index
    %3 = vector.load %arg2[%c0, %c0_1] : memref<8x128xf32, #tpu.memory_space<vmem>>, vector<8x128xf32>
    %c0_2 = arith.constant 0 : index
    %c0_3 = arith.constant 0 : index
    %4 = vector.load %arg3[%c0_2, %c0_3] : memref<8x128xf32, #tpu.memory_space<vmem>>, vector<8x128xf32>
    %cst = arith.constant 1.000000e+00 : f32
    %5 = vector.broadcast %cst : f32 to vector<8x128xf32>
    %6 = arith.cmpf oeq, %4, %5 : vector<8x128xf32>
    %7 = arith.extui %6 : vector<8x128xi1> to vector<8x128xi32>
    %8 = arith.sitofp %7 : vector<8x128xi32> to vector<8x128xf32>
    %cst_4 = arith.constant 0.000000e+00 : f32
    %9 = vector.broadcast %cst_4 : f32 to vector<8x128xf32>
    %10 = arith.cmpf oeq, %4, %9 : vector<8x128xf32>
    %11 = arith.extui %10 : vector<8x128xi1> to vector<8x128xi32>
    %12 = arith.sitofp %11 : vector<8x128xi32> to vector<8x128xf32>
    %cst_5 = arith.constant 0.000000e+00 : f32
    %13 = vector.broadcast %cst_5 : f32 to vector<8x128xf32>
    %14 = arith.maximumf %3, %13 : vector<8x128xf32>
    %15 = arith.mulf %3, %4 : vector<8x128xf32>
    %16 = arith.subf %14, %15 : vector<8x128xf32>
    %17 = math.absf %3 : vector<8x128xf32>
    %cst_6 = arith.constant 0.000000e+00 : f32
    %18 = vector.broadcast %cst_6 : f32 to vector<8x128xf32>
    %19 = arith.subf %18, %17 : vector<8x128xf32>
    %20 = math.exp %19 : vector<8x128xf32>
    %21 = math.log1p %20 : vector<8x128xf32>
    %22 = arith.addf %16, %21 : vector<8x128xf32>
    %c0_7 = arith.constant 0 : index
    %c0_8 = arith.constant 0 : index
    %23 = vector.load %arg5[%c0_7, %c0_8] : memref<8x128xf32, #tpu.memory_space<vmem>>, vector<8x128xf32>
    %24 = vector.shape_cast %8 : vector<8x128xf32> to vector<1x8x128xf32>
    %cst_9 = arith.constant dense<0.000000e+00> : vector<8x128xf32>
    %25 = vector.multi_reduction <add>, %24, %cst_9 [0] : vector<1x8x128xf32> to vector<8x128xf32>
    %26 = arith.addf %23, %25 : vector<8x128xf32>
    %c0_10 = arith.constant 0 : index
    %c0_11 = arith.constant 0 : index
    %27 = vector.load %arg5[%c0_10, %c0_11] : memref<8x128xf32, #tpu.memory_space<vmem>>, vector<8x128xf32>
    tpu.vector_store %arg5[%c0_10, %c0_11], %26 {strides = array<i32>} : memref<8x128xf32, #tpu.memory_space<vmem>>, vector<8x128xf32>,
    %c0_12 = arith.constant 0 : index
    %c0_13 = arith.constant 0 : index
    %28 = vector.load %arg6[%c0_12, %c0_13] : memref<8x128xf32, #tpu.memory_space<vmem>>, vector<8x128xf32>
    %29 = vector.shape_cast %12 : vector<8x128xf32> to vector<1x8x128xf32>
    %cst_14 = arith.constant dense<0.000000e+00> : vector<8x128xf32>
    %30 = vector.multi_reduction <add>, %29, %cst_14 [0] : vector<1x8x128xf32> to vector<8x128xf32>
    %31 = arith.addf %28, %30 : vector<8x128xf32>
    %c0_15 = arith.constant 0 : index
    %c0_16 = arith.constant 0 : index
    %32 = vector.load %arg6[%c0_15, %c0_16] : memref<8x128xf32, #tpu.memory_space<vmem>>, vector<8x128xf32>
    tpu.vector_store %arg6[%c0_15, %c0_16], %31 {strides = array<i32>} : memref<8x128xf32, #tpu.memory_space<vmem>>, vector<8x128xf32>,
    %c0_17 = arith.constant 0 : index
    %c0_18 = arith.constant 0 : index
    %33 = vector.load %arg7[%c0_17, %c0_18] : memref<8x128xf32, #tpu.memory_space<vmem>>, vector<8x128xf32>
    %34 = arith.mulf %22, %8 : vector<8x128xf32>
    %35 = vector.shape_cast %34 : vector<8x128xf32> to vector<1x8x128xf32>
    %cst_19 = arith.constant dense<0.000000e+00> : vector<8x128xf32>
    %36 = vector.multi_reduction <add>, %35, %cst_19 [0] : vector<1x8x128xf32> to vector<8x128xf32>
    %37 = arith.addf %33, %36 : vector<8x128xf32>
    %c0_20 = arith.constant 0 : index
    %c0_21 = arith.constant 0 : index
    %38 = vector.load %arg7[%c0_20, %c0_21] : memref<8x128xf32, #tpu.memory_space<vmem>>, vector<8x128xf32>
    tpu.vector_store %arg7[%c0_20, %c0_21], %37 {strides = array<i32>} : memref<8x128xf32, #tpu.memory_space<vmem>>, vector<8x128xf32>,
    %c0_22 = arith.constant 0 : index
    %c0_23 = arith.constant 0 : index
    %39 = vector.load %arg8[%c0_22, %c0_23] : memref<8x128xf32, #tpu.memory_space<vmem>>, vector<8x128xf32>
    %40 = arith.mulf %22, %12 : vector<8x128xf32>
    %41 = vector.shape_cast %40 : vector<8x128xf32> to vector<1x8x128xf32>
    %cst_24 = arith.constant dense<0.000000e+00> : vector<8x128xf32>
    %42 = vector.multi_reduction <add>, %41, %cst_24 [0] : vector<1x8x128xf32> to vector<8x128xf32>
    %43 = arith.addf %39, %42 : vector<8x128xf32>
    %c0_25 = arith.constant 0 : index
    %c0_26 = arith.constant 0 : index
    %44 = vector.load %arg8[%c0_25, %c0_26] : memref<8x128xf32, #tpu.memory_space<vmem>>, vector<8x128xf32>
    tpu.vector_store %arg8[%c0_25, %c0_26], %43 {strides = array<i32>} : memref<8x128xf32, #tpu.memory_space<vmem>>, vector<8x128xf32>,
    %c0_i32_27 = arith.constant 0 : i32
    %45 = arith.cmpi eq, %arg1, %c0_i32_27 : i32
    %46 = arith.extui %45 : i1 to i32
    %c0_i32_28 = arith.constant 0 : i32
    %47 = arith.cmpi ne, %46, %c0_i32_28 : i32
    scf.if %47 {
      %c0_29 = arith.constant 0 : index
      %c0_30 = arith.constant 0 : index
      %48 = vector.load %arg5[%c0_29, %c0_30] : memref<8x128xf32, #tpu.memory_space<vmem>>, vector<8x128xf32>
      %c0_31 = arith.constant 0 : index
      %c0_32 = arith.constant 0 : index
      %c0_33 = arith.constant 0 : index
      %c0_34 = arith.constant 0 : index
      %49 = vector.load %arg4[%c0_31, %c0_32, %c0_33, %c0_34] : memref<1x4x8x128xf32, #tpu.memory_space<vmem>>, vector<1x1x8x128xf32>
      %50 = vector.shape_cast %49 : vector<1x1x8x128xf32> to vector<8x128xf32>
      %51 = vector.shape_cast %48 : vector<8x128xf32> to vector<1x1x8x128xf32>
      tpu.vector_store %arg4[%c0_31, %c0_32, %c0_33, %c0_34], %51 {strides = array<i32>} : memref<1x4x8x128xf32, #tpu.memory_space<vmem>>, vector<1x1x8x128xf32>,
      %c0_35 = arith.constant 0 : index
      %c0_36 = arith.constant 0 : index
      %52 = vector.load %arg6[%c0_35, %c0_36] : memref<8x128xf32, #tpu.memory_space<vmem>>, vector<8x128xf32>
      %c0_37 = arith.constant 0 : index
      %c1 = arith.constant 1 : index
      %c0_38 = arith.constant 0 : index
      %c0_39 = arith.constant 0 : index
      %53 = vector.load %arg4[%c0_37, %c1, %c0_38, %c0_39] : memref<1x4x8x128xf32, #tpu.memory_space<vmem>>, vector<1x1x8x128xf32>
      %54 = vector.shape_cast %53 : vector<1x1x8x128xf32> to vector<8x128xf32>
      %55 = vector.shape_cast %52 : vector<8x128xf32> to vector<1x1x8x128xf32>
      tpu.vector_store %arg4[%c0_37, %c1, %c0_38, %c0_39], %55 {strides = array<i32>} : memref<1x4x8x128xf32, #tpu.memory_space<vmem>>, vector<1x1x8x128xf32>,
      %c0_40 = arith.constant 0 : index
      %c0_41 = arith.constant 0 : index
      %56 = vector.load %arg7[%c0_40, %c0_41] : memref<8x128xf32, #tpu.memory_space<vmem>>, vector<8x128xf32>
      %c0_42 = arith.constant 0 : index
      %c2 = arith.constant 2 : index
      %c0_43 = arith.constant 0 : index
      %c0_44 = arith.constant 0 : index
      %57 = vector.load %arg4[%c0_42, %c2, %c0_43, %c0_44] : memref<1x4x8x128xf32, #tpu.memory_space<vmem>>, vector<1x1x8x128xf32>
      %58 = vector.shape_cast %57 : vector<1x1x8x128xf32> to vector<8x128xf32>
      %59 = vector.shape_cast %56 : vector<8x128xf32> to vector<1x1x8x128xf32>
      tpu.vector_store %arg4[%c0_42, %c2, %c0_43, %c0_44], %59 {strides = array<i32>} : memref<1x4x8x128xf32, #tpu.memory_space<vmem>>, vector<1x1x8x128xf32>,
      %c0_45 = arith.constant 0 : index
      %c0_46 = arith.constant 0 : index
      %60 = vector.load %arg8[%c0_45, %c0_46] : memref<8x128xf32, #tpu.memory_space<vmem>>, vector<8x128xf32>
      %c0_47 = arith.constant 0 : index
      %c3 = arith.constant 3 : index
      %c0_48 = arith.constant 0 : index
      %c0_49 = arith.constant 0 : index
      %61 = vector.load %arg4[%c0_47, %c3, %c0_48, %c0_49] : memref<1x4x8x128xf32, #tpu.memory_space<vmem>>, vector<1x1x8x128xf32>
      %62 = vector.shape_cast %61 : vector<1x1x8x128xf32> to vector<8x128xf32>
      %63 = vector.shape_cast %60 : vector<8x128xf32> to vector<1x1x8x128xf32>
      tpu.vector_store %arg4[%c0_47, %c3, %c0_48, %c0_49], %63 {strides = array<i32>} : memref<1x4x8x128xf32, #tpu.memory_space<vmem>>, vector<1x1x8x128xf32>,
    } else {
    }
    return
  }
  func.func @transform_0(%arg0: i32, %arg1: i32) -> (i32, i32) {
    %c1_i32 = arith.constant 1 : i32
    %0 = arith.muli %arg0, %c1_i32 : i32
    %1 = arith.addi %0, %arg1 : i32
    %c0_i32 = arith.constant 0 : i32
    %c0_i32_0 = arith.constant 0 : i32
    return %1, %c0_i32 : i32, i32
  }
  func.func @transform_1(%arg0: i32, %arg1: i32) -> (i32, i32) {
    %c1_i32 = arith.constant 1 : i32
    %0 = arith.muli %arg0, %c1_i32 : i32
    %1 = arith.addi %0, %arg1 : i32
    %c0_i32 = arith.constant 0 : i32
    %c0_i32_0 = arith.constant 0 : i32
    return %1, %c0_i32 : i32, i32
  }
  func.func @transform_2(%arg0: i32, %arg1: i32) -> (i32, i32, i32, i32) {
    %c0_i32 = arith.constant 0 : i32
    %c0_i32_0 = arith.constant 0 : i32
    %c0_i32_1 = arith.constant 0 : i32
    %c0_i32_2 = arith.constant 0 : i32
    return %arg0, %c0_i32, %c0_i32_0, %c0_i32_1 : i32, i32, i32, i32
  }
}

</mosaic_0001>

<bundles_post_ra>
// kernel: tpu_custom_call.1
= control target key start
LH: loop header
LB: loop body
LE: loop exit
PB: predicated region body
PF: predicated region fallthrough
CT: control target
= control target key end

     0   :  { %7 = vsyncpa [#allocation7], 0  ;;  %s268_s0 = inlined_call_operand.hbm [shape: f32[8,128], index: 0, kind: input, shape index: {}]   ;;  %s269_s1 = inlined_call_operand.hbm [shape: f32[8,128], index: 1, kind: input, shape index: {}]   ;;  %s270_s2 = inlined_call_operand.hbm [shape: f32[1,4,8,128], index: 2, kind: output, shape index: {}]  }
   0x1   :  { %8 = vsyncpa [#allocation10], 0 }
   0x2   :  { %9 = vsyncpa [#allocation8], 0  ;;  %s211_s9 = smov [#allocation6]   ;;  %s212_s11 = smov [#allocation9]  }
   0x3   :  { %s19_s10 = sshll.u32 %s211_s9, 4  ;;  %s32_s12 = sshll.u32 %s212_s11, 4  ;;  %s20_s10 = int_to_ptr.vmem [resolvable:$true] %s19_s10  ;;  %s33_s12 = int_to_ptr.vmem [resolvable:$true] %s32_s12 }
   0x4   :  { %s139_s15 = scalar_lea.hbm %s268_s0, 128 }
   0x5   :  { %p140_p0 = scmp.ne.s32.totalorder %s268_s0, %s139_s15  ;;  %p143_p1 = scmp.lt.u32.totalorder %s139_s15, %s268_s0 }
   0x7   :  { %p145_p2 = pnand %p143_p1, %p140_p0 }
   0x9   :  { %148 = shalt.err (!%p145_p2)
}
   0xa   :  { %s149_s20 = scalar_lea.vmem %s20_s10, 128  ;;  %p154_p4 = scmp.lt.s32.totalorder %s20_s10, %s20_s10 }
   0xb   :  { %p150_p3 = scmp.ne.s32.totalorder %s20_s10, %s149_s20  ;;  %p155_p5 = scmp.lt.s32.totalorder %s149_s20, %s149_s20 }
   0xd   :  { %p156_p6 = por %p155_p5, %p154_p4 }
   0xf   :  { %p157_p7 = pnand %p156_p6, %p150_p3 }
  0x11   :  { %160 = shalt.err (!%p157_p7)
}
  0x12   :  { %22 = dma.hbm_to_vmem [thread:$0]  %s268_s0, 128, %s20_s10, [#allocation7]  }
  0x13   :  { %s161_s25 = scalar_lea.hbm %s269_s1, 128 }
  0x14   :  { %p162_p8 = scmp.ne.s32.totalorder %s269_s1, %s161_s25  ;;  %p165_p9 = scmp.lt.u32.totalorder %s161_s25, %s269_s1 }
  0x16   :  { %p167_p10 = pnand %p165_p9, %p162_p8 }
  0x18   :  { %170 = shalt.err (!%p167_p10)
}
  0x19   :  { %s171_s30 = scalar_lea.vmem %s33_s12, 128  ;;  %p176_p12 = scmp.lt.s32.totalorder %s33_s12, %s33_s12 }
  0x1a   :  { %p172_p11 = scmp.ne.s32.totalorder %s33_s12, %s171_s30  ;;  %p177_p13 = scmp.lt.s32.totalorder %s171_s30, %s171_s30 }
  0x1c   :  { %p178_p0 = por %p177_p13, %p176_p12 }
  0x1e   :  { %p179_p1 = pnand %p178_p0, %p172_p11 }
  0x20   :  { %182 = shalt.err (!%p179_p1)
}
  0x21   :  { %35 = dma.hbm_to_vmem [thread:$0]  %s269_s1, 128, %s33_s12, [#allocation10]  }
  0x22   :  { %205 = dma.done.wait [#allocation7], 128  }
  0x23   :  { %206 = vsyncadd [#allocation7], 4294967168 }
  0x24   :  { %207 = dma.done.wait [#allocation10], 128  }
  0x25   :  { %208 = vsyncadd [#allocation10], 4294967168  ;;  %v52_v0 = vld [vmem:[#allocation6] sm:$0xff]  ;;  %v53_v1 = vld [vmem:[#allocation9] sm:$0xff]  ;;  %v213_v3 = vmov 0.0   ;;  %s214_s1 = smov [#allocation11]  }
  0x26   :  { %vm54_vm0 = vcmp.eq.f32.partialorder %v53_v1, 1.0  ;;  %v63_v2 = vand.u32 2147483647, %v52_v0  ;;  %vm57_vm1 = vcmp.eq.f32.partialorder %v53_v1, 0.0  ;;  %v61_v12 = vmul.f32 %v53_v1, %v52_v0  ;;  %s114_s4 = sshll.u32 %s214_s1, 4  ;;  %s115_s4 = int_to_ptr.vmem [resolvable:$true] %s114_s4 }
  0x27   :  { %v127_v4 = vsel %vm54_vm0, 1.0, %v213_v3  ;;  %v128_v5 = vsel %vm57_vm1, 1.0, %v213_v3  ;;  %v60_v13 = vmax.f32 %v52_v0, 0.0  ;;  %s183_s5 = scalar_lea.vmem %s115_s4, 512  ;;  %p188_p3 = scmp.lt.s32.totalorder %s115_s4, %s115_s4 }
  0x28   :  { %v64_v6 = vsub.f32 0.0, %v63_v2  ;;  %99 = vst [vmem:[#allocation11] sm:$0xff] %v127_v4  ;;  %102 = vst [vmem:[#allocation11 + $0x8] sm:$0xff] %v128_v5  ;;  %p184_p2 = scmp.ne.s32.totalorder %s115_s4, %s183_s5  ;;  %p189_p4 = scmp.lt.s32.totalorder %s183_s5, %s183_s5 }
  0x29   :  { %v62_v17 = vsub.f32 %v60_v13, %v61_v12 }
  0x2a   :  { %v65_v7 = vmul.f32 1.442695, %v64_v6  ;;  %p190_p5 = por %p189_p4, %p188_p3 }
  0x2c   :  { %135 = vpow2.f32 %v65_v7  ;;  %p191_p6 = pnand %p190_p5, %p184_p2 }
  0x36   :  { %v136_v8 = vpop.eup %135 }
  0x37   :  { %v67_v9 = vadd.f32 1.0, %v136_v8  ;;  %v70_v10 = vmul.f32 -0.5, %v136_v8  ;;  %v73_v14 = vand.u32 2147483647, %v136_v8 }
  0x39   :  { %137 = vlog2.f32 %v67_v9  ;;  %v71_v11 = vadd.f32 1.0, %v70_v10  ;;  %vm74_vm2 = vcmp.lt.f32.partialorder %v73_v14, 0.0004427343 }
  0x3b   :  { %v72_v15 = vmul.f32 %v136_v8, %v71_v11 }
  0x43   :  { %v138_v16 = vpop.eup %137 }
  0x44   :  { %v69_v18 = vmul.f32 0.6931472, %v138_v16 }
  0x46   :  { %v75_v19 = vsel %vm74_vm2, %v72_v15, %v69_v18 }
  0x47   :  { %v76_v20 = vadd.f32 %v75_v19, %v62_v17 }
  0x49   :  { %v86_v21 = vmul.f32 %v127_v4, %v76_v20  ;;  %v91_v22 = vmul.f32 %v128_v5, %v76_v20 }
  0x4b   :  { %105 = vst [vmem:[#allocation11 + $0x10] sm:$0xff] %v86_v21  ;;  %108 = vst [vmem:[#allocation11 + $0x18] sm:$0xff] %v91_v22 }
  0x4c   :  { %194 = shalt.err (!%p191_p6)
}
  0x4d   :  { %s195_s8 = scalar_lea.hbm %s270_s2, 512 }
  0x4e   :  { %p196_p7 = scmp.ne.s32.totalorder %s270_s2, %s195_s8  ;;  %p199_p8 = scmp.lt.u32.totalorder %s195_s8, %s270_s2 }
  0x50   :  { %p201_p9 = pnand %p199_p8, %p196_p7 }
  0x52   :  { %204 = shalt.err (!%p201_p9)
}
  0x53   :  { %s215_s13 = smov 128   ;;  %s216_s14 = smov 8  }
  0x54   :  { %120 = dma.vmem_to_hbm [thread:$0]  %s115_s4, 512, %s270_s2, [#allocation8], %s215_s13, %s215_s13, %s216_s14  }
  0x55   :  { %209 = dma.done.wait [#allocation8], 512  }
  0x56   :  { %210 = vsyncadd [#allocation8], 4294966784 }
  0x57   :  { %124 = vsyncpa [#allocation7], 1 }
  0x58   :  { %125 = vsyncpa [#allocation10], 1 }
  0x59   :  { %126 = vsyncpa [#allocation8], 1 }

</bundles_post_ra>
